<compile_context>
chip_gen: v6e
topology: v6e:2x2x1
jax: 0.10.0
libtpu: 0.0.40
codegen_flags: <defaults>
</compile_context>

<pallas_src>
import jax
import jax.numpy as jnp
from jax import lax
from jax.experimental import pallas as pl
from jax.experimental.pallas import tpu as pltpu

EPS = 1e-5


# ---------------------------------------------------------------------------
# Kernels
# ---------------------------------------------------------------------------
def _bn_stats_kernel(x_ref, s_ref, sq_ref):
    """Accumulate per-channel sum / sum-of-squares across the batch axis.

    grid = (C_blocks, N); N is the accumulation ("arbitrary") axis.
    x_ref:  (c_blk, HW) block of one sample.
    s_ref / sq_ref: (c_blk, 1) f32 accumulators (same block across N).
    """
    @pl.when(pl.program_id(1) == 0)
    def _():
        s_ref[...] = jnp.zeros_like(s_ref)
        sq_ref[...] = jnp.zeros_like(sq_ref)

    x = x_ref[...].astype(jnp.float32)                    # (c_blk, HW)
    s_ref[...] += jnp.sum(x, axis=-1, keepdims=True)      # lane reduce (XLU)
    sq_ref[...] += jnp.sum(x * x, axis=-1, keepdims=True)


def _ibn_apply_kernel(x_ref, inw_ref, inb_ref, abn_ref, bbn_ref, o_ref):
    """Fused IN-stats + per-element affine normalization for one (n, c) block.

    out = x * (in_scale * inw + abn) + ((inb - mu * in_scale * inw) + bbn)

    where (mu, in_scale) are the per-(n, c) InstanceNorm statistics computed
    here, and (abn, bbn) already carry the (blended) BatchNorm scale/shift.
    """
    x = x_ref[...]                                        # (c_blk, HW)
    xf = x.astype(jnp.float32)                            # per-tile upcast only
    inv_hw = jnp.float32(1.0 / x.shape[-1])

    # One traversal: sum and sum-of-squares (f32 accumulation).
    s = jnp.sum(xf, axis=-1, keepdims=True)               # (c_blk, 1)
    sq = jnp.sum(xf * xf, axis=-1, keepdims=True)
    mu = s * inv_hw
    var = jnp.maximum(sq * inv_hw - mu * mu, 0.0)
    in_scale = lax.rsqrt(var + EPS)                       # EUP rsqrt

    g = in_scale * inw_ref[...]                           # (c_blk, 1)
    scale = g + abn_ref[...]
    shift = (inb_ref[...] - mu * g) + bbn_ref[...]

    # Single lane-dense store of the final value.
    o_ref[...] = (xf * scale + shift).astype(o_ref.dtype)


# ---------------------------------------------------------------------------
# pallas_call wrappers
# ---------------------------------------------------------------------------
def _pick_c_block(C, HW, budget_bytes=2 << 20):
    """Largest legal channel block (== C, or a multiple of 8 dividing C)
    whose f32 working block stays under `budget_bytes`."""
    per_c = max(HW, 128) * 4
    legal = [C] + [d for d in range(8, C, 8) if C % d == 0]
    fitting = [d for d in legal if d * per_c <= budget_bytes]
    return max(fitting) if fitting else min(legal)


def _bn_channel_stats(x3, c_blk, vmem_limit):
    """Per-channel (sum, sum_of_squares) over (N, HW) as two (C, 1) arrays."""
    N, C, HW = x3.shape
    n_cb = C // c_blk
    cost = pl.CostEstimate(
        flops=int(3 * N * C * HW),
        transcendentals=0,
        bytes_accessed=int(x3.size * x3.dtype.itemsize + 8 * C),
    )
    return pl.pallas_call(
        _bn_stats_kernel,
        out_shape=(jax.ShapeDtypeStruct((C, 1), jnp.float32),
                   jax.ShapeDtypeStruct((C, 1), jnp.float32)),
        grid=(n_cb, N),
        in_specs=[pl.BlockSpec((None, c_blk, HW), lambda c, n: (n, c, 0))],
        out_specs=(pl.BlockSpec((c_blk, 1), lambda c, n: (c, 0)),
                   pl.BlockSpec((c_blk, 1), lambda c, n: (c, 0))),
        compiler_params=pltpu.CompilerParams(
            dimension_semantics=("parallel", "arbitrary"),
            vmem_limit_bytes=vmem_limit),
        cost_estimate=cost,
    )(x3)


def _ibn_apply(x3, inw, inb, abn, bbn, c_blk, vmem_limit):
    N, C, HW = x3.shape
    n_cb = C // c_blk
    cost = pl.CostEstimate(
        flops=int(8 * N * C * HW),
        transcendentals=int(N * C),
        bytes_accessed=int(2 * x3.size * x3.dtype.itemsize + 16 * C),
    )
    blk = pl.BlockSpec((None, c_blk, HW), lambda n, c: (n, c, 0))
    par = pl.BlockSpec((c_blk, 1), lambda n, c: (c, 0))
    return pl.pallas_call(
        _ibn_apply_kernel,
        out_shape=jax.ShapeDtypeStruct((N, C, HW), x3.dtype),
        grid=(N, n_cb),
        in_specs=[blk, par, par, par, par],
        out_specs=blk,
        compiler_params=pltpu.CompilerParams(
            dimension_semantics=("parallel", "parallel"),
            vmem_limit_bytes=vmem_limit),
        cost_estimate=cost,
    )(x3, inw.reshape(C, 1), inb.reshape(C, 1),
      abn.reshape(C, 1), bbn.reshape(C, 1))


# ---------------------------------------------------------------------------
# Module wrapper (parameter setup + tiny per-channel coefficient prep).
# ---------------------------------------------------------------------------
class IBNPallas:
    def __init__(self, in_channel: int, ibn_type: str = "a",
                 key=jax.random.PRNGKey(42)):
        self.type = ibn_type
        self.in_channel = in_channel
        self.half = in_channel // 2
        rest = in_channel - self.half

        # PyTorch default init is weight=1, bias=0; perturb deterministically
        # so the affine path is actually exercised.
        ks = jax.random.split(key, 8)
        f32 = jnp.float32
        self.half_IN_w = (1.0 + 0.1 * jax.random.normal(ks[0], (self.half,))).astype(f32)
        self.half_IN_b = (0.1 * jax.random.normal(ks[1], (self.half,))).astype(f32)
        self.half_BN_w = (1.0 + 0.1 * jax.random.normal(ks[2], (rest,))).astype(f32)
        self.half_BN_b = (0.1 * jax.random.normal(ks[3], (rest,))).astype(f32)
        self.IN_w = (1.0 + 0.1 * jax.random.normal(ks[4], (in_channel,))).astype(f32)
        self.IN_b = (0.1 * jax.random.normal(ks[5], (in_channel,))).astype(f32)
        self.BN_w = (1.0 + 0.1 * jax.random.normal(ks[6], (in_channel,))).astype(f32)
        self.BN_b = (0.1 * jax.random.normal(ks[7], (in_channel,))).astype(f32)

    def __call__(self, x_nchw):
        N, C, H, W = x_nchw.shape
        assert C == self.in_channel
        HW = H * W
        f32 = jnp.float32
        half = self.half

        # Free, contiguous reshape (no transpose): NCHW -> (N, C, H*W).
        x3 = x_nchw.reshape(N, C, HW)

        # Per-channel blend of IN / BN (tiny (C,) vectors, plain JAX).
        if self.type == "a":
            inw = jnp.concatenate([self.half_IN_w, jnp.zeros(C - half, f32)])
            inb = jnp.concatenate([self.half_IN_b, jnp.zeros(C - half, f32)])
            bnw = jnp.concatenate([jnp.zeros(half, f32), self.half_BN_w])
            bnb = jnp.concatenate([jnp.zeros(half, f32), self.half_BN_b])
            beta = jnp.concatenate([jnp.zeros(half, f32), jnp.ones(C - half, f32)])
            need_bn = True
        elif self.type == "b":
            inw, inb = self.IN_w, self.IN_b
            bnw = jnp.zeros(C, f32)
            bnb = jnp.zeros(C, f32)
            beta = jnp.zeros(C, f32)
            need_bn = False
        elif self.type == "c":
            inw, inb = self.IN_w, self.IN_b
            bnw, bnb = self.BN_w, self.BN_b
            beta = jnp.ones(C, f32)
            need_bn = True
        else:
            raise NotImplementedError(f"IBN type {self.type!r} not supported")

        c_blk = _pick_c_block(C, HW)
        # VMEM budget: double-buffered in+out blocks + f32 working copy + slack.
        blk_in = c_blk * HW * x3.dtype.itemsize
        blk_f32 = c_blk * HW * 4
        vmem_need = 4 * blk_in + 3 * blk_f32 + (2 << 20)
        vmem_limit = int(min(max(vmem_need, 16 << 20), 64 << 20))

        if need_bn:
            s, sq = _bn_channel_stats(x3, c_blk, vmem_limit)
            cnt = jnp.float32(N * HW)
            bn_mu = s[:, 0] / cnt
            bn_var = jnp.maximum(sq[:, 0] / cnt - bn_mu * bn_mu, 0.0)
            bn_scale = lax.rsqrt(bn_var + EPS)
        else:
            bn_mu = jnp.zeros(C, f32)
            bn_scale = jnp.ones(C, f32)

        # Fold BN normalization + affine + blend into per-channel constants.
        abn = beta * bn_scale * bnw
        bbn = beta * (bnb - bn_mu * bn_scale * bnw)

        out3 = _ibn_apply(x3, inw, inb, abn, bbn, c_blk, vmem_limit)
        return out3.reshape(N, C, H, W)


# ---------------------------------------------------------------------------
# Pure-JAX reference (computed directly in NCHW) for validation.
# ---------------------------------------------------------------------------
def _in_ref(x, w, b):  # x: NCHW
    mu = jnp.mean(x, axis=(2, 3), keepdims=True)
    var = jnp.mean((x - mu) ** 2, axis=(2, 3), keepdims=True)
    xn = (x - mu) / jnp.sqrt(var + EPS)
    return xn * w[None, :, None, None] + b[None, :, None, None]


def _bn_ref(x, w, b):  # x: NCHW
    mu = jnp.mean(x, axis=(0, 2, 3), keepdims=True)
    var = jnp.mean((x - mu) ** 2, axis=(0, 2, 3), keepdims=True)
    xn = (x - mu) / jnp.sqrt(var + EPS)
    return xn * w[None, :, None, None] + b[None, :, None, None]


def ibn_reference(mod: IBNPallas, x):
    h = mod.half
    if mod.type == "a":
        o1 = _in_ref(x[:, :h], mod.half_IN_w, mod.half_IN_b)
        o2 = _bn_ref(x[:, h:], mod.half_BN_w, mod.half_BN_b)
        return jnp.concatenate([o1, o2], axis=1)
    if mod.type == "b":
        return _in_ref(x, mod.IN_w, mod.IN_b)
    if mod.type == "c":
        return _in_ref(x, mod.IN_w, mod.IN_b) + _bn_ref(x, mod.BN_w, mod.BN_b)
    raise NotImplementedError


if __name__ == "__main__":
    key = jax.random.PRNGKey(0)
    kx, kp = jax.random.split(key)
    N, C, H, W = 2, 4, 16, 16
    x = jax.random.normal(kx, (N, C, H, W), dtype=jnp.float32)

    ok = True
    for t in ("a", "b", "c"):
        mod = IBNPallas(C, t, key=kp)
        out = jax.block_until_ready(mod(x))
        ref = ibn_reference(mod, x)
        if out.shape != (N, C, H, W):
            ok = False
        if not bool(jnp.allclose(out, ref, rtol=1e-4, atol=1e-4)):
            ok = False

    if ok:
        print("KERNEL_OK")
    else:
        print("MISMATCH")
</pallas_src>

<mosaic_0001>
module attributes {stable_mosaic.version = 11 : i64} {
  func.func @_bn_stats_kernel(%arg0: i32, %arg1: i32, %arg2: memref<1x4x256xf32, #tpu.memory_space<vmem>>, %arg3: memref<4x1xf32, #tpu.memory_space<vmem>>, %arg4: memref<4x1xf32, #tpu.memory_space<vmem>>) attributes {dimension_semantics = [#tpu.dimension_semantics<parallel>, #tpu.dimension_semantics<arbitrary>], iteration_bounds = array<i64: 1, 2>, scalar_prefetch = 0 : i64, scratch_operands = 0 : i64, tpu.core_type = #tpu.core_type<tc>, window_params = [{transform_indices = @transform_0, window_bounds = array<i64: 1, 4, 256>}, {transform_indices = @transform_1, window_bounds = array<i64: 4, 1>}, {transform_indices = @transform_2, window_bounds = array<i64: 4, 1>}]} {
    %c0_i32 = arith.constant 0 : i32
    %0 = arith.cmpi eq, %arg1, %c0_i32 : i32
    %1 = arith.extui %0 : i1 to i32
    %c0_i32_0 = arith.constant 0 : i32
    %2 = arith.cmpi ne, %1, %c0_i32_0 : i32
    scf.if %2 {
      %cst_12 = arith.constant 0.000000e+00 : f32
      %16 = vector.broadcast %cst_12 : f32 to vector<4x1xf32>
      %c0_13 = arith.constant 0 : index
      %c0_14 = arith.constant 0 : index
      %17 = vector.load %arg3[%c0_13, %c0_14] : memref<4x1xf32, #tpu.memory_space<vmem>>, vector<4x1xf32>
      tpu.vector_store %arg3[%c0_13, %c0_14], %16 {strides = array<i32>} : memref<4x1xf32, #tpu.memory_space<vmem>>, vector<4x1xf32>,
      %cst_15 = arith.constant 0.000000e+00 : f32
      %18 = vector.broadcast %cst_15 : f32 to vector<4x1xf32>
      %c0_16 = arith.constant 0 : index
      %c0_17 = arith.constant 0 : index
      %19 = vector.load %arg4[%c0_16, %c0_17] : memref<4x1xf32, #tpu.memory_space<vmem>>, vector<4x1xf32>
      tpu.vector_store %arg4[%c0_16, %c0_17], %18 {strides = array<i32>} : memref<4x1xf32, #tpu.memory_space<vmem>>, vector<4x1xf32>,
    } else {
    }
    %c0 = arith.constant 0 : index
    %c0_1 = arith.constant 0 : index
    %c0_2 = arith.constant 0 : index
    %3 = vector.load %arg2[%c0, %c0_1, %c0_2] : memref<1x4x256xf32, #tpu.memory_space<vmem>>, vector<1x4x256xf32>
    %4 = vector.shape_cast %3 : vector<1x4x256xf32> to vector<4x256xf32>
    %c0_3 = arith.constant 0 : index
    %c0_4 = arith.constant 0 : index
    %5 = vector.load %arg3[%c0_3, %c0_4] : memref<4x1xf32, #tpu.memory_space<vmem>>, vector<4x1xf32>
    %cst = arith.constant dense<0.000000e+00> : vector<4xf32>
    %6 = vector.multi_reduction <add>, %4, %cst [1] : vector<4x256xf32> to vector<4xf32>
    %7 = vector.shape_cast %6 : vector<4xf32> to vector<4x1xf32>
    %8 = arith.addf %5, %7 : vector<4x1xf32>
    %c0_5 = arith.constant 0 : index
    %c0_6 = arith.constant 0 : index
    %9 = vector.load %arg3[%c0_5, %c0_6] : memref<4x1xf32, #tpu.memory_space<vmem>>, vector<4x1xf32>
    tpu.vector_store %arg3[%c0_5, %c0_6], %8 {strides = array<i32>} : memref<4x1xf32, #tpu.memory_space<vmem>>, vector<4x1xf32>,
    %c0_7 = arith.constant 0 : index
    %c0_8 = arith.constant 0 : index
    %10 = vector.load %arg4[%c0_7, %c0_8] : memref<4x1xf32, #tpu.memory_space<vmem>>, vector<4x1xf32>
    %11 = arith.mulf %4, %4 : vector<4x256xf32>
    %cst_9 = arith.constant dense<0.000000e+00> : vector<4xf32>
    %12 = vector.multi_reduction <add>, %11, %cst_9 [1] : vector<4x256xf32> to vector<4xf32>
    %13 = vector.shape_cast %12 : vector<4xf32> to vector<4x1xf32>
    %14 = arith.addf %10, %13 : vector<4x1xf32>
    %c0_10 = arith.constant 0 : index
    %c0_11 = arith.constant 0 : index
    %15 = vector.load %arg4[%c0_10, %c0_11] : memref<4x1xf32, #tpu.memory_space<vmem>>, vector<4x1xf32>
    tpu.vector_store %arg4[%c0_10, %c0_11], %14 {strides = array<i32>} : memref<4x1xf32, #tpu.memory_space<vmem>>, vector<4x1xf32>,
    return
  }
  func.func @transform_0(%arg0: i32, %arg1: i32) -> (i32, i32, i32) {
    %c0_i32 = arith.constant 0 : i32
    %c0_i32_0 = arith.constant 0 : i32
    return %arg1, %arg0, %c0_i32 : i32, i32, i32
  }
  func.func @transform_1(%arg0: i32, %arg1: i32) -> (i32, i32) {
    %c0_i32 = arith.constant 0 : i32
    %c0_i32_0 = arith.constant 0 : i32
    return %arg0, %c0_i32 : i32, i32
  }
  func.func @transform_2(%arg0: i32, %arg1: i32) -> (i32, i32) {
    %c0_i32 = arith.constant 0 : i32
    %c0_i32_0 = arith.constant 0 : i32
    return %arg0, %c0_i32 : i32, i32
  }
}

</mosaic_0001>

<bundles_post_ra>
// kernel: tpu_custom_call.1
= control target key start
LH: loop header
LB: loop body
LE: loop exit
PB: predicated region body
PF: predicated region fallthrough
CT: control target
= control target key end

     0   :  { %8 = vsyncpa [#allocation3], 0  ;;  %s603_s0 = inlined_call_operand.hbm [shape: f32[2,4,256], index: 0, kind: input, shape index: {}]   ;;  %s604_s1 = inlined_call_operand.vmem [shape: f32[4,1], index: 1, kind: output, shape index: {0}]   ;;  %s605_s2 = inlined_call_operand.vmem [shape: f32[4,1], index: 2, kind: output, shape index: {1}]  }
   0x1   :  { %10 = vsyncpa [#allocation3 + $0x1], 0  ;;  %s489_s9 = smov 0   ;;  %s491_s10 = smov 0  }
   0x2   :  { %s493_s11 = smov 0   ;;  %s495_s12 = smov 0  }
   0x3   :  { %s497_s13 = smov 0   ;;  %s499_s14 = smov 0  }
   0x4 LB: > { %s321_s15 = sadd.s32 4294967295, %s470_s14   ;;  %s25_s16 = sadd.s32 1, %s466_s13  ;;  %s470_s14 = sphi %s499_s14, %s16_s14   ;;  %s466_s13 = sphi %s497_s13, %s613_s13   ;;  %s462_s12 = sphi %s495_s12, %s612_s12   ;;  %s458_s11 = sphi %s493_s11, %s611_s11   ;;  %s454_s10 = sphi %s491_s10, %s610_s10   ;;  %s450_s9 = sphi %s489_s9, %s609_s9  }
   0x5   : > { %p26_p0 = scmp.ge.s32.totalorder %s25_s16, 2  ;;  %s37_s17 = sadd.s32 1, %s458_s11 }
   0x6   : > { %p44_p1 = scmp.ne.s32.totalorder %s458_s11, %s454_s10  ;;  %p45_p2 = scmp.eq.s32.totalorder %s470_s14, 0 }
   0x7   : > { %s615_s16 = smov (%p26_p0, %s25_s16), 0  ;;  %p50_p4 = scmp.ne.s32.totalorder %s454_s10, %s450_s9 }
   0x8   : > { %p525_p3 = por %p45_p2, %p44_p1  ;;  %s32_s19 = ssub.s32 %s466_s13, %s615_s16 }
   0x9   : > { %p51_p5 = scmp.eq.s32.totalorder %s321_s15, 0  ;;  %p35_p6 = scmp.eq.s32.totalorder %s32_s19, 0 }
   0xa   : > { %p341_p8 = scmp.lt.s32.totalorder %s470_s14, 2  ;;  %s126_s22 = sand.u32 1, %s458_s11  }
   0xb   : > { %p532_p7 = por %p51_p5, %p50_p4  ;;  %s334_s23 = sshll.u32 %s466_s13, 7 }
   0xc   : > { %s538_s21 = scalar_select %p35_p6, %s458_s11, %s37_s17  }
   0xd   : > { %s324_s24 = sshll.u32 %s126_s22, 3  ;;  %s138_s27 = scalar_lea.hbm %s603_s0, %s334_s23 }
   0xe   : > { %s130_s28 = scalar_lea.vmem [#allocation2], %s324_s24  ;;  %p547_p9 = pnand %p341_p8, %p525_p3 }
   0xf   : > { %s140_s29 = sshll.u32 %s130_s28, 4  ;;  %p327_p10 = scmp.ge.s32.totalorder %s470_s14, 1  ;;  %s141_s29 = int_to_ptr.vmem [resolvable:$true] %s140_s29 }
  0x10   : > { %p145_p11 = scmp.lt.s32.totalorder %s470_s14, 3  ;;  %s127_s3 = scalar_lea.sflag [#allocation3], %s126_s22 }
  0x11   : > { %p394_p12 = pneg %p547_p9  ;;  %s405_s4 = scalar_lea.vmem %s141_s29, 128 }
  0x12   : > { %p406_p13 = scmp.ne.s32.totalorder %s141_s29, %s405_s4  ;;  %s472_s5 = smov [#allocation2]  }
  0x13   : > { %s410_s6 = sshll.u32 %s472_s5, 4  ;;  %s411_s6 = int_to_ptr.vmem [resolvable:$false] %s410_s6 }
  0x14   : > { %p408_p0 = pnand %p406_p13, %p394_p12  ;;  %s412_s7 = scalar_lea.vmem %s411_s6, 256 }
  0x15   : > { %p413_p2 = scmp.lt.s32.totalorder %s141_s29, %s411_s6  ;;  %p414_p3 = scmp.lt.s32.totalorder %s412_s7, %s405_s4 }
  0x16   : > { %p409_p1 = pneg %p408_p0 }
  0x17   : > { %p415_p4 = por %p414_p3, %p413_p2 }
  0x19   : > { %p416_p5 = pnand %p415_p4, %p409_p1 }
  0x1b   : > { %419 = shalt.err (!%p416_p5)
}
  0x1c   : > { %340 = dma.hbm_to_vmem [thread:$0]  (!%p547_p9), %s138_s27, 128, %s141_s29, %s127_s3  }
  0x1d   : > { %p146_p6 = pnand %p327_p10, %p145_p11 }
  0x1e   : > { %s151_s8 = sand.u32 (!%p146_p6), 1, %s454_s10  }
  0x1f   : > { %149 = sbr.rel (%p146_p6) target bundleno = 197 (0xc5), region = 24  ;;  %s328_s9 = sshll.u32 (!%p146_p6), %s151_s8, 3 }
  0x20   : > { %s152_s15 = scalar_lea.sflag (!%p146_p6), [#allocation3], %s151_s8  ;;  %s155_s17 = scalar_lea.vmem (!%p146_p6), [#allocation2], %s328_s9 }
  0x24   : > { %445 = dma.done.wait (%p532_p7), %s152_s15, 128  }
  0x25   : > { %447 = vsyncadd (%p532_p7), %s152_s15, 4294967168  ;;  %p329_p8 = scmp.ne.s32.totalorder %s462_s12, 0 }
  0x27   : > { %190 = sbr.rel (%p329_p8) target bundleno = 46 (0x2e), region = 32 }
  0x2c   : > { %vm191_vm0 = vcmask 3072   ;;  %v473_v0 = vmov 0.0  }
  0x2d   : > { %192 = vst.msk [vmem:[%s604_s1] sm:$0xf] %vm191_vm0, %v473_v0  ;;  %193 = vst.msk [vmem:[%s605_s2] sm:$0xf] %vm191_vm0, %v473_v0 }
  0x2e PF: > { %v194_v1 = vld [vmem:[%s155_s17] sm:$0xff]  ;;  %vm199_vm1 = vcmask 1043456   ;;  %vm206_vm2 = vcmask 3072  }
  0x2f   : > { %v197_v2 = vcombine.high %v194_v1, %v194_v1  ;;  %v200_v3 = vsel %vm199_vm1, %v194_v1, 0.0  ;;  %v209_v4 = vmul.f32 %v194_v1, %v194_v1 }
  0x31   : > { %v201_v5 = vsel %vm199_vm1, %v197_v2, 0.0  ;;  %v211_v6 = vcombine.high %v209_v4, %v209_v4  ;;  %v213_v7 = vsel %vm199_vm1, %v209_v4, 0.0 }
  0x32   : > { %v202_v8 = vadd.f32 %v201_v5, %v200_v3 }
  0x33   : > { %v214_v9 = vsel %vm199_vm1, %v211_v6, 0.0 }
  0x34   : > { %203 = vadd.xlane.f32.xlu0 %v202_v8  ;;  %v215_v10 = vadd.f32 %v214_v9, %v213_v7  ;;  %v195_v11 = vld [vmem:[%s604_s1] sm:$0xf] }
  0x35   : > { %v208_v14 = vld [vmem:[%s605_s2] sm:$0xf] }
  0x38   : > { %216 = vadd.xlane.f32.xlu0 %v215_v10 }
  0xbd   : > { %v204_v12 = vpop.xlane.xlu0 %203 }
  0xbe   : > { %v205_v13 = vadd.f32 %v204_v12, %v195_v11 }
  0xc0   : > { %207 = vst.msk [vmem:[%s604_s1] sm:$0xf] %vm206_vm2, %v205_v13 }
  0xc1   : > { %v217_v15 = vpop.xlane.xlu0 %216 }
  0xc2   : > { %v218_v16 = vadd.f32 %v217_v15, %v208_v14 }
  0xc4   : > { %219 = vst.msk [vmem:[%s605_s2] sm:$0xf] %vm206_vm2, %v218_v16 }
  0xc5 PF: > { %s16_s14 = sadd.s32 1, %s470_s14   ;;  %s609_s9 = smov %s454_s10 }
  0xc6   : > { %p13_p7 = scmp.ge.s32.totalorder %s16_s14, 4   ;;  %s610_s10 = smov %s458_s11 }
  0xc7   : > { %s611_s11 = smov %s538_s21  ;;  %s612_s12 = smov %s466_s13 }
  0xc8   : > { %s613_s13 = smov %s615_s16  ;;  %15 = sbr.rel (!%p13_p7) target bundleno = 4 (0x4), region = 80 }
  0xcd   :  { %253 = vsyncpa [#allocation3], 1 }
  0xce   :  { %255 = vsyncpa [#allocation3 + $0x1], 1 }

</bundles_post_ra>
